<compile_context>
chip_gen: v7x
topology: tpu7x:2x2x1
jax: 0.10.0
libtpu: 0.0.40
codegen_flags: <defaults>
</compile_context>

<pallas_src>
import numpy as np
import jax
import jax.numpy as jnp
from jax import lax
from jax.experimental import pallas as pl
from jax.experimental.pallas import tpu as pltpu

# ----------------------------- model dims ----------------------------------
B = 2          # batch
NT = 8         # timesteps
OBS_DIM = 16   # state_encode.input_size
ACT_DIM = 8    # action_encode.input_size
HIDDEN = 32    # causal_block.hidden_size
RSA_OCC = 2    # len("oa")
SEQ = NT * RSA_OCC        # 16
S_TOT = B * SEQ           # 32  (whole batch folded into one invocation)
N_OT = B * NT             # 16  ('o' rows per invocation)
S4 = S_TOT // 4           # 8   (output sublane height)
MLP_DIM = 4 * HIDDEN      # 128
PM_POS = 0     # 'o'
WM_POS = 1     # 'a'
LANES = 128
IN_W = 32      # packed input lane width: [obs(16) | act(8) | onehot(2) | pad]
NEG_INF = -1e30

# ---------------- weight-slab row offsets (all multiples of 8) --------------
R_ENC = 0       # rows  0:32, lanes  0:32  -> W_enc_ext (incl. bias/type rows)
                # rows  0:32, lanes 32:64  -> A   = (1/sqrt(H)) * Wq @ Wk^T
                # rows  0:32, lanes 64:96  -> WvO = Wv @ Wo
R_W1 = 32       # rows 32:64               -> W1   (HIDDEN, MLP_DIM)
R_W2 = 64       # rows 64:96               -> W2^T (HIDDEN, MLP_DIM)
R_PRM = 96      # rows 96:104              -> ln1_g, ln1_b, ln2_g, ln2_b, b1, b2
R_MASK = 104    # rows 104:136, lanes 0:32 -> additive attention mask bias
SLAB_ROWS = R_MASK + S_TOT   # 136


def _build_mask_bias() -> np.ndarray:
    """Additive attention bias (0 / -1e30) over the block-order rows:
    N_OT 'o' tokens (batch-major, time-minor) followed by N_OT 'a' tokens.
    Encodes (a) causality over the true interleaved positions (o_t at 2t,
    a_t at 2t+1) and (b) a same-batch block-diagonal so the folded batches
    never attend to each other."""
    idx = np.arange(S_TOT)
    is_a = (idx >= N_OT).astype(np.int64)
    r = idx - is_a * N_OT
    batch = r // NT
    pos = 2 * (r % NT) + is_a
    ok = (batch[:, None] == batch[None, :]) & (pos[:, None] >= pos[None, :])
    return np.where(ok, 0.0, NEG_INF).astype(np.float32)


# ------------------------------ kernel --------------------------------------
def _decision_kernel(xin_ref, wslab_ref, out_ref):
    ws = wslab_ref[...]                                   # (136, 128) one DMA

    ln1_g = ws[R_PRM + 0:R_PRM + 1, :HIDDEN]
    ln1_b = ws[R_PRM + 1:R_PRM + 2, :HIDDEN]
    ln2_g = ws[R_PRM + 2:R_PRM + 3, :HIDDEN]
    ln2_b = ws[R_PRM + 3:R_PRM + 4, :HIDDEN]
    b1 = ws[R_PRM + 4:R_PRM + 5, :]
    b2 = ws[R_PRM + 5:R_PRM + 6, :HIDDEN]
    mask = ws[R_MASK:R_MASK + S_TOT, :S_TOT]

    # ---- encoder: single matmul; biases + type embeddings are weight rows ----
    x = jnp.dot(xin_ref[...], ws[R_ENC:R_ENC + IN_W, :HIDDEN],
                preferred_element_type=jnp.float32)       # (S_TOT, HIDDEN)

    def layer_norm(v, g, b):
        # one-pass stats: the two cross-lane reductions are independent
        mu = jnp.mean(v, axis=-1, keepdims=True)
        ms = jnp.mean(v * v, axis=-1, keepdims=True)
        return (v - mu) * lax.rsqrt(ms - mu * mu + 1e-5) * g + b

    # ---- pre-LN single-head causal attention, offline-folded weights --------
    xn = layer_norm(x, ln1_g, ln1_b)
    t = jnp.dot(xn, ws[R_ENC:R_ENC + HIDDEN, HIDDEN:3 * HIDDEN],
                preferred_element_type=jnp.float32)       # (S_TOT, 2H) = [xn@A | xn@WvO]
    # scores = (xn @ A) @ xn^T  (contract trailing dims; no transpose)
    scores = lax.dot_general(t[:, :HIDDEN], xn, (((1,), (1,)), ((), ())),
                             preferred_element_type=jnp.float32) + mask
    scores = scores - jnp.max(scores, axis=-1, keepdims=True)
    p = jnp.exp(scores)
    attn = p * pl.reciprocal(jnp.sum(p, axis=-1, keepdims=True), approx=True)
    x = x + jnp.dot(attn, t[:, HIDDEN:], preferred_element_type=jnp.float32)

    # ---- pre-LN MLP ----------------------------------------------------------
    # TODO(synk): PyTorch nn.GELU defaults to the exact erf form; the tanh
    # approximation is used here (erf lowering availability is uncertain).
    xn2 = layer_norm(x, ln2_g, ln2_b)
    h = jax.nn.gelu(jnp.dot(xn2, ws[R_W1:R_W1 + HIDDEN, :],
                            preferred_element_type=jnp.float32) + b1)
    x = x + lax.dot_general(h, ws[R_W2:R_W2 + HIDDEN, :], (((1,), (1,)), ((), ())),
                            preferred_element_type=jnp.float32) + b2

    # ---- lane-dense output: 4 row-chunks side by side, one unmasked store ----
    out_ref[...] = jnp.concatenate(
        [x[0:S4], x[S4:2 * S4], x[2 * S4:3 * S4], x[3 * S4:4 * S4]], axis=1)


_call = pl.pallas_call(
    _decision_kernel,
    out_shape=jax.ShapeDtypeStruct((S4, LANES), jnp.float32),
    grid=(1,),
    in_specs=[
        pl.BlockSpec((S_TOT, IN_W), lambda i: (0, 0)),
        pl.BlockSpec((SLAB_ROWS, LANES), lambda i: (0, 0)),
    ],
    out_specs=pl.BlockSpec((S4, LANES), lambda i: (0, 0)),
    compiler_params=pltpu.CompilerParams(dimension_semantics=("arbitrary",)),
)


# ------------------------------ wrapper --------------------------------------
@jax.jit
def potar_decision_forward(o_arr, a_arr, wslab):
    """Mirrors POTARDecisionModel.forward(o, None, None, a, None).

    Returns (wm_out, pm_out, new_cache):
      wm_out    [B, NT, H]           outputs at the 'a' (world-model) positions
      pm_out    [B, NT, H]           outputs at the 'o' (policy-model) positions
      new_cache [B, NT*rsa_occ, H]   interleaved hidden states
    """
    # --- pack one lane-padded input slab (layout plumbing only) ---
    o2 = o_arr.reshape(N_OT, OBS_DIM)
    a2 = a_arr.reshape(N_OT, ACT_DIM)
    x_in = jnp.zeros((S_TOT, IN_W), jnp.float32)
    x_in = x_in.at[:N_OT, :OBS_DIM].set(o2)
    x_in = x_in.at[:N_OT, OBS_DIM + ACT_DIM].set(1.0)              # 'o' indicator
    x_in = x_in.at[N_OT:, OBS_DIM:OBS_DIM + ACT_DIM].set(a2)
    x_in = x_in.at[N_OT:, OBS_DIM + ACT_DIM + 1].set(1.0)          # 'a' indicator

    out = _call(x_in, wslab)                                       # (S4, 128)

    # --- un-pack (layout plumbing only) ---
    # lane chunks -> block-order rows
    xb = out.reshape(S4, 4, HIDDEN)
    xb = jnp.transpose(xb, (1, 0, 2)).reshape(S_TOT, HIDDEN)
    # block order ('o' rows then 'a' rows, batch-major) -> (batch, type, time)
    x4 = xb.reshape(RSA_OCC, B, NT, HIDDEN)
    x4 = jnp.transpose(x4, (1, 0, 2, 3))                           # (B, RSA_OCC, NT, H)
    pm_out = x4[:, PM_POS]
    wm_out = x4[:, WM_POS]
    new_cache = jnp.transpose(x4, (0, 2, 1, 3)).reshape(B, SEQ, HIDDEN)
    return wm_out, pm_out, new_cache


# ------------------------- deterministic params ------------------------------
def init_params(key):
    ks = jax.random.split(key, 9)

    def lin(k, fan_in, fan_out):
        return jax.random.normal(k, (fan_in, fan_out), jnp.float32) / jnp.sqrt(
            jnp.float32(fan_in))

    return {
        "w_so": lin(ks[0], OBS_DIM, HIDDEN),
        "b_so": jnp.zeros((1, HIDDEN), jnp.float32),
        "w_sa": lin(ks[1], ACT_DIM, HIDDEN),
        "b_sa": jnp.zeros((1, HIDDEN), jnp.float32),
        "type_query": jax.random.normal(ks[2], (RSA_OCC, HIDDEN), jnp.float32),
        "ln1_g": jnp.ones((1, HIDDEN), jnp.float32),
        "ln1_b": jnp.zeros((1, HIDDEN), jnp.float32),
        "w_q": lin(ks[3], HIDDEN, HIDDEN),
        "w_k": lin(ks[4], HIDDEN, HIDDEN),
        "w_v": lin(ks[5], HIDDEN, HIDDEN),
        "w_o": lin(ks[6], HIDDEN, HIDDEN),
        "ln2_g": jnp.ones((1, HIDDEN), jnp.float32),
        "ln2_b": jnp.zeros((1, HIDDEN), jnp.float32),
        "w_1": lin(ks[7], HIDDEN, MLP_DIM),
        "b_1": jnp.zeros((1, MLP_DIM), jnp.float32),
        "w_2": lin(ks[8], MLP_DIM, HIDDEN),
        "b_2": jnp.zeros((1, HIDDEN), jnp.float32),
    }


def pack_params(p):
    """One-time offline parameter preprocessing:
      - fold A = (1/sqrt(H)) * Wq @ Wk^T and WvO = Wv @ Wo (single-head, exact);
      - extend the stacked encoder weight with bias/type-embedding rows so the
        encoder becomes one matmul over the packed input slab;
      - store W2 transposed (contraction done via dot_general on trailing dims);
      - pack everything, the LayerNorm/bias vectors and the constant additive
        causal mask into ONE lane-dense (136, 128) f32 slab -> one DMA."""
    scale = 1.0 / float(np.sqrt(HIDDEN))
    A = (p["w_q"] * scale) @ p["w_k"].T                    # (H, H)
    WvO = p["w_v"] @ p["w_o"]                              # (H, H)

    w_enc_ext = jnp.zeros((IN_W, HIDDEN), jnp.float32)
    w_enc_ext = w_enc_ext.at[:OBS_DIM, :].set(p["w_so"])
    w_enc_ext = w_enc_ext.at[OBS_DIM:OBS_DIM + ACT_DIM, :].set(p["w_sa"])
    w_enc_ext = w_enc_ext.at[OBS_DIM + ACT_DIM, :].set(
        (p["b_so"] + p["type_query"][0]).reshape(-1))
    w_enc_ext = w_enc_ext.at[OBS_DIM + ACT_DIM + 1, :].set(
        (p["b_sa"] + p["type_query"][1]).reshape(-1))

    wslab = jnp.zeros((SLAB_ROWS, LANES), jnp.float32)
    wslab = wslab.at[R_ENC:R_ENC + IN_W, :HIDDEN].set(w_enc_ext)
    wslab = wslab.at[R_ENC:R_ENC + HIDDEN, HIDDEN:2 * HIDDEN].set(A)
    wslab = wslab.at[R_ENC:R_ENC + HIDDEN, 2 * HIDDEN:3 * HIDDEN].set(WvO)
    wslab = wslab.at[R_W1:R_W1 + HIDDEN, :MLP_DIM].set(p["w_1"])
    wslab = wslab.at[R_W2:R_W2 + HIDDEN, :MLP_DIM].set(p["w_2"].T)
    wslab = wslab.at[R_PRM + 0, :HIDDEN].set(p["ln1_g"].reshape(-1))
    wslab = wslab.at[R_PRM + 1, :HIDDEN].set(p["ln1_b"].reshape(-1))
    wslab = wslab.at[R_PRM + 2, :HIDDEN].set(p["ln2_g"].reshape(-1))
    wslab = wslab.at[R_PRM + 3, :HIDDEN].set(p["ln2_b"].reshape(-1))
    wslab = wslab.at[R_PRM + 4, :MLP_DIM].set(p["b_1"].reshape(-1))
    wslab = wslab.at[R_PRM + 5, :HIDDEN].set(p["b_2"].reshape(-1))
    wslab = wslab.at[R_MASK:R_MASK + S_TOT, :S_TOT].set(
        jnp.asarray(_build_mask_bias()))
    return wslab


if __name__ == "__main__":
    key = jax.random.PRNGKey(0)
    k_o, k_a, k_p = jax.random.split(key, 3)
    o_arr = jax.random.normal(k_o, (B, NT, OBS_DIM), jnp.float32)
    a_arr = jax.random.normal(k_a, (B, NT, ACT_DIM), jnp.float32)
    params = init_params(k_p)
    wslab = pack_params(params)

    wm_out, pm_out, new_cache = potar_decision_forward(o_arr, a_arr, wslab)
    jax.block_until_ready((wm_out, pm_out, new_cache))

    assert wm_out.shape == (B, NT, HIDDEN)
    assert pm_out.shape == (B, NT, HIDDEN)
    assert new_cache.shape == (B, NT * RSA_OCC, HIDDEN)
    print("KERNEL_OK")
</pallas_src>

<mosaic_0001>
module attributes {stable_mosaic.version = 11 : i64} {
  func.func @_decision_kernel(%arg0: i32, %arg1: memref<32x32xf32, #tpu.memory_space<vmem>>, %arg2: memref<136x128xf32, #tpu.memory_space<vmem>>, %arg3: memref<8x128xf32, #tpu.memory_space<vmem>>) attributes {dimension_semantics = [#tpu.dimension_semantics<arbitrary>], iteration_bounds = array<i64: 1>, scalar_prefetch = 0 : i64, scratch_operands = 0 : i64, tpu.core_type = #tpu.core_type<tc>, window_params = [{pipeline_mode = #tpu.pipeline_mode<synchronous>, transform_indices = @transform_0, window_bounds = array<i64: 32, 32>}, {pipeline_mode = #tpu.pipeline_mode<synchronous>, transform_indices = @transform_1, window_bounds = array<i64: 136, 128>}, {pipeline_mode = #tpu.pipeline_mode<synchronous>, transform_indices = @transform_2, window_bounds = array<i64: 8, 128>}]} {
    %c0 = arith.constant 0 : index
    %c0_0 = arith.constant 0 : index
    %0 = vector.load %arg2[%c0, %c0_0] : memref<136x128xf32, #tpu.memory_space<vmem>>, vector<136x128xf32>
    %1 = vector.extract_strided_slice %0 {offsets = [96, 0], sizes = [1, 32], strides = [1, 1]} : vector<136x128xf32> to vector<1x32xf32>
    %2 = vector.extract_strided_slice %0 {offsets = [97, 0], sizes = [1, 32], strides = [1, 1]} : vector<136x128xf32> to vector<1x32xf32>
    %3 = vector.extract_strided_slice %0 {offsets = [98, 0], sizes = [1, 32], strides = [1, 1]} : vector<136x128xf32> to vector<1x32xf32>
    %4 = vector.extract_strided_slice %0 {offsets = [99, 0], sizes = [1, 32], strides = [1, 1]} : vector<136x128xf32> to vector<1x32xf32>
    %5 = vector.extract_strided_slice %0 {offsets = [100, 0], sizes = [1, 128], strides = [1, 1]} : vector<136x128xf32> to vector<1x128xf32>
    %6 = vector.extract_strided_slice %0 {offsets = [101, 0], sizes = [1, 32], strides = [1, 1]} : vector<136x128xf32> to vector<1x32xf32>
    %7 = vector.extract_strided_slice %0 {offsets = [104, 0], sizes = [32, 32], strides = [1, 1]} : vector<136x128xf32> to vector<32x32xf32>
    %c0_1 = arith.constant 0 : index
    %c0_2 = arith.constant 0 : index
    %8 = vector.load %arg1[%c0_1, %c0_2] : memref<32x32xf32, #tpu.memory_space<vmem>>, vector<32x32xf32>
    %9 = vector.extract_strided_slice %0 {offsets = [0, 0], sizes = [32, 32], strides = [1, 1]} : vector<136x128xf32> to vector<32x32xf32>
    %cst = arith.constant dense<0.000000e+00> : vector<32x32xf32>
    %10 = tpu.matmul %8, %9, %cst {dimension_numbers = #tpu.dot_dimension_numbers<[1], [0], [0], [1], [0, 0, 1, 1], [], []>} : vector<32x32xf32>, vector<32x32xf32>, vector<32x32xf32> -> vector<32x32xf32>
    %cst_3 = arith.constant dense<0.000000e+00> : vector<32xf32>
    %11 = vector.multi_reduction <add>, %10, %cst_3 [1] : vector<32x32xf32> to vector<32xf32>
    %12 = vector.shape_cast %11 : vector<32xf32> to vector<32x1xf32>
    %cst_4 = arith.constant 3.200000e+01 : f32
    %13 = vector.broadcast %cst_4 : f32 to vector<32x1xf32>
    %14 = arith.divf %12, %13 : vector<32x1xf32>
    %15 = arith.mulf %10, %10 : vector<32x32xf32>
    %cst_5 = arith.constant dense<0.000000e+00> : vector<32xf32>
    %16 = vector.multi_reduction <add>, %15, %cst_5 [1] : vector<32x32xf32> to vector<32xf32>
    %17 = vector.shape_cast %16 : vector<32xf32> to vector<32x1xf32>
    %cst_6 = arith.constant 3.200000e+01 : f32
    %18 = vector.broadcast %cst_6 : f32 to vector<32x1xf32>
    %19 = arith.divf %17, %18 : vector<32x1xf32>
    %20 = vector.broadcast %14 : vector<32x1xf32> to vector<32x32xf32>
    %21 = arith.subf %10, %20 : vector<32x32xf32>
    %22 = arith.mulf %14, %14 : vector<32x1xf32>
    %23 = arith.subf %19, %22 : vector<32x1xf32>
    %cst_7 = arith.constant 9.99999974E-6 : f32
    %24 = vector.broadcast %cst_7 : f32 to vector<32x1xf32>
    %25 = arith.addf %23, %24 : vector<32x1xf32>
    %26 = math.rsqrt %25 : vector<32x1xf32>
    %27 = vector.broadcast %26 : vector<32x1xf32> to vector<32x32xf32>
    %28 = arith.mulf %21, %27 : vector<32x32xf32>
    %29 = vector.broadcast %1 : vector<1x32xf32> to vector<32x32xf32>
    %30 = arith.mulf %28, %29 : vector<32x32xf32>
    %31 = vector.broadcast %2 : vector<1x32xf32> to vector<32x32xf32>
    %32 = arith.addf %30, %31 : vector<32x32xf32>
    %33 = vector.extract_strided_slice %0 {offsets = [0, 32], sizes = [32, 64], strides = [1, 1]} : vector<136x128xf32> to vector<32x64xf32>
    %cst_8 = arith.constant dense<0.000000e+00> : vector<32x64xf32>
    %34 = tpu.matmul %32, %33, %cst_8 {dimension_numbers = #tpu.dot_dimension_numbers<[1], [0], [0], [1], [0, 0, 1, 1], [], []>} : vector<32x32xf32>, vector<32x64xf32>, vector<32x64xf32> -> vector<32x64xf32>
    %35 = vector.extract_strided_slice %34 {offsets = [0, 0], sizes = [32, 32], strides = [1, 1]} : vector<32x64xf32> to vector<32x32xf32>
    %cst_9 = arith.constant dense<0.000000e+00> : vector<32x32xf32>
    %36 = tpu.matmul %35, %32, %cst_9 {dimension_numbers = #tpu.dot_dimension_numbers<[1], [1], [0], [0], [0, 0, 1, 0], [], []>} : vector<32x32xf32>, vector<32x32xf32>, vector<32x32xf32> -> vector<32x32xf32>
    %37 = arith.addf %36, %7 : vector<32x32xf32>
    %cst_10 = arith.constant dense<0xFF800000> : vector<32xf32>
    %38 = vector.multi_reduction <maximumf>, %37, %cst_10 [1] : vector<32x32xf32> to vector<32xf32>
    %39 = vector.shape_cast %38 : vector<32xf32> to vector<32x1xf32>
    %40 = vector.broadcast %39 : vector<32x1xf32> to vector<32x32xf32>
    %41 = arith.subf %37, %40 : vector<32x32xf32>
    %42 = math.exp %41 : vector<32x32xf32>
    %cst_11 = arith.constant dense<0.000000e+00> : vector<32xf32>
    %43 = vector.multi_reduction <add>, %42, %cst_11 [1] : vector<32x32xf32> to vector<32xf32>
    %44 = vector.shape_cast %43 : vector<32xf32> to vector<32x1xf32>
    %45 = tpu.reciprocal %44 {approx = true} : vector<32x1xf32> -> vector<32x1xf32>
    %46 = vector.broadcast %45 : vector<32x1xf32> to vector<32x32xf32>
    %47 = arith.mulf %42, %46 : vector<32x32xf32>
    %48 = vector.extract_strided_slice %34 {offsets = [0, 32], sizes = [32, 32], strides = [1, 1]} : vector<32x64xf32> to vector<32x32xf32>
    %cst_12 = arith.constant dense<0.000000e+00> : vector<32x32xf32>
    %49 = tpu.matmul %47, %48, %cst_12 {dimension_numbers = #tpu.dot_dimension_numbers<[1], [0], [0], [1], [0, 0, 1, 1], [], []>} : vector<32x32xf32>, vector<32x32xf32>, vector<32x32xf32> -> vector<32x32xf32>
    %50 = arith.addf %10, %49 : vector<32x32xf32>
    %cst_13 = arith.constant dense<0.000000e+00> : vector<32xf32>
    %51 = vector.multi_reduction <add>, %50, %cst_13 [1] : vector<32x32xf32> to vector<32xf32>
    %52 = vector.shape_cast %51 : vector<32xf32> to vector<32x1xf32>
    %cst_14 = arith.constant 3.200000e+01 : f32
    %53 = vector.broadcast %cst_14 : f32 to vector<32x1xf32>
    %54 = arith.divf %52, %53 : vector<32x1xf32>
    %55 = arith.mulf %50, %50 : vector<32x32xf32>
    %cst_15 = arith.constant dense<0.000000e+00> : vector<32xf32>
    %56 = vector.multi_reduction <add>, %55, %cst_15 [1] : vector<32x32xf32> to vector<32xf32>
    %57 = vector.shape_cast %56 : vector<32xf32> to vector<32x1xf32>
    %cst_16 = arith.constant 3.200000e+01 : f32
    %58 = vector.broadcast %cst_16 : f32 to vector<32x1xf32>
    %59 = arith.divf %57, %58 : vector<32x1xf32>
    %60 = vector.broadcast %54 : vector<32x1xf32> to vector<32x32xf32>
    %61 = arith.subf %50, %60 : vector<32x32xf32>
    %62 = arith.mulf %54, %54 : vector<32x1xf32>
    %63 = arith.subf %59, %62 : vector<32x1xf32>
    %cst_17 = arith.constant 9.99999974E-6 : f32
    %64 = vector.broadcast %cst_17 : f32 to vector<32x1xf32>
    %65 = arith.addf %63, %64 : vector<32x1xf32>
    %66 = math.rsqrt %65 : vector<32x1xf32>
    %67 = vector.broadcast %66 : vector<32x1xf32> to vector<32x32xf32>
    %68 = arith.mulf %61, %67 : vector<32x32xf32>
    %69 = vector.broadcast %3 : vector<1x32xf32> to vector<32x32xf32>
    %70 = arith.mulf %68, %69 : vector<32x32xf32>
    %71 = vector.broadcast %4 : vector<1x32xf32> to vector<32x32xf32>
    %72 = arith.addf %70, %71 : vector<32x32xf32>
    %73 = vector.extract_strided_slice %0 {offsets = [32, 0], sizes = [32, 128], strides = [1, 1]} : vector<136x128xf32> to vector<32x128xf32>
    %cst_18 = arith.constant dense<0.000000e+00> : vector<32x128xf32>
    %74 = tpu.matmul %72, %73, %cst_18 {dimension_numbers = #tpu.dot_dimension_numbers<[1], [0], [0], [1], [0, 0, 1, 1], [], []>} : vector<32x32xf32>, vector<32x128xf32>, vector<32x128xf32> -> vector<32x128xf32>
    %75 = vector.broadcast %5 : vector<1x128xf32> to vector<32x128xf32>
    %76 = arith.addf %74, %75 : vector<32x128xf32>
    %77 = arith.mulf %76, %76 : vector<32x128xf32>
    %78 = arith.mulf %76, %77 : vector<32x128xf32>
    %cst_19 = arith.constant 4.471500e-02 : f32
    %79 = vector.broadcast %cst_19 : f32 to vector<32x128xf32>
    %80 = arith.mulf %79, %78 : vector<32x128xf32>
    %81 = arith.addf %76, %80 : vector<32x128xf32>
    %cst_20 = arith.constant 0.797884583 : f32
    %82 = vector.broadcast %cst_20 : f32 to vector<32x128xf32>
    %83 = arith.mulf %82, %81 : vector<32x128xf32>
    %84 = math.tanh %83 : vector<32x128xf32>
    %cst_21 = arith.constant 1.000000e+00 : f32
    %85 = vector.broadcast %cst_21 : f32 to vector<32x128xf32>
    %86 = arith.addf %85, %84 : vector<32x128xf32>
    %cst_22 = arith.constant 5.000000e-01 : f32
    %87 = vector.broadcast %cst_22 : f32 to vector<32x128xf32>
    %88 = arith.mulf %87, %86 : vector<32x128xf32>
    %89 = arith.mulf %76, %88 : vector<32x128xf32>
    %90 = vector.extract_strided_slice %0 {offsets = [64, 0], sizes = [32, 128], strides = [1, 1]} : vector<136x128xf32> to vector<32x128xf32>
    %cst_23 = arith.constant dense<0.000000e+00> : vector<32x32xf32>
    %91 = tpu.matmul %89, %90, %cst_23 {dimension_numbers = #tpu.dot_dimension_numbers<[1], [1], [0], [0], [0, 0, 1, 0], [], []>} : vector<32x128xf32>, vector<32x128xf32>, vector<32x32xf32> -> vector<32x32xf32>
    %92 = arith.addf %50, %91 : vector<32x32xf32>
    %93 = vector.broadcast %6 : vector<1x32xf32> to vector<32x32xf32>
    %94 = arith.addf %92, %93 : vector<32x32xf32>
    %95 = vector.extract_strided_slice %94 {offsets = [0, 0], sizes = [8, 32], strides = [1, 1]} : vector<32x32xf32> to vector<8x32xf32>
    %96 = vector.extract_strided_slice %94 {offsets = [8, 0], sizes = [8, 32], strides = [1, 1]} : vector<32x32xf32> to vector<8x32xf32>
    %97 = vector.extract_strided_slice %94 {offsets = [16, 0], sizes = [8, 32], strides = [1, 1]} : vector<32x32xf32> to vector<8x32xf32>
    %98 = vector.extract_strided_slice %94 {offsets = [24, 0], sizes = [8, 32], strides = [1, 1]} : vector<32x32xf32> to vector<8x32xf32>
    %99 = tpu.concatenate %95, %96, %97, %98 in 1 : vector<8x32xf32>, vector<8x32xf32>, vector<8x32xf32>, vector<8x32xf32> -> vector<8x128xf32>
    %c0_24 = arith.constant 0 : index
    %c0_25 = arith.constant 0 : index
    %100 = vector.load %arg3[%c0_24, %c0_25] : memref<8x128xf32, #tpu.memory_space<vmem>>, vector<8x128xf32>
    tpu.vector_store %arg3[%c0_24, %c0_25], %99 {strides = array<i32>} : memref<8x128xf32, #tpu.memory_space<vmem>>, vector<8x128xf32>,
    return
  }
  func.func @transform_0(%arg0: i32) -> (i32, i32) {
    %c0_i32 = arith.constant 0 : i32
    %c0_i32_0 = arith.constant 0 : i32
    %c0_i32_1 = arith.constant 0 : i32
    return %c0_i32, %c0_i32_0 : i32, i32
  }
  func.func @transform_1(%arg0: i32) -> (i32, i32) {
    %c0_i32 = arith.constant 0 : i32
    %c0_i32_0 = arith.constant 0 : i32
    %c0_i32_1 = arith.constant 0 : i32
    return %c0_i32, %c0_i32_0 : i32, i32
  }
  func.func @transform_2(%arg0: i32) -> (i32, i32) {
    %c0_i32 = arith.constant 0 : i32
    %c0_i32_0 = arith.constant 0 : i32
    %c0_i32_1 = arith.constant 0 : i32
    return %c0_i32, %c0_i32_0 : i32, i32
  }
}

</mosaic_0001>

<bundles_post_ra>
// kernel: potar_decision_forward.1
= control target key start
LH: loop header
LB: loop body
LE: loop exit
PB: predicated region body
PF: predicated region fallthrough
CT: control target
= control target key end

     0   :  { %vm32_vm0 = vcmask 261120   ;;  %v191_v40 = vlaneseq  ;;  %s1179_s23 = smov 64   ;;  %vm897_vm2 = vcmask 523264   ;;  %vm899_vm3 = vcmask 785408   ;;  %s1397_s1 = inlined_call_operand.vmem [shape: f32[136,128], index: 1, kind: input, shape index: {}]   ;;  %s1398_s0 = inlined_call_operand.vmem [shape: f32[32,32], index: 0, kind: input, shape index: {}]   ;;  %s1399_s2 = inlined_call_operand.vmem [shape: f32[8,128], index: 2, kind: output, shape index: {}]  }
   0x1   :  { %v11_v0 = vld [vmem:[%s1397_s1] sm:$0xff]  ;;  %v12_v1 = vld [vmem:[%s1397_s1 + $0x8] sm:$0xff]  ;;  %v13_v2 = vld [vmem:[%s1397_s1 + $0x10] sm:$0xff] }
   0x2   :  { %v1117_v3 = vpack.i.bf16 %v12_v1, %v11_v0  ;;  %v1062_v4 = vpack.c.bf16 %v12_v1, %v11_v0  ;;  %v14_v5 = vld [vmem:[%s1397_s1 + $0x18] sm:$0xff]  ;;  %v28_v6 = vld [vmem:[%s1398_s0] sm:$0xff]  ;;  %v29_v8 = vld [vmem:[%s1398_s0 + $0x8] sm:$0xff]  ;;  %v1253_v47 = vshrl.u32 %v191_v40, 7 }
   0x3   :  { %v1066_v7 = vpack.c.bf16 %v14_v5, %v13_v2  ;;  %986 = vmatprep.mubr.msk.f32.mxu1 %vm32_vm0, %v28_v6  ;;  %v30_v9 = vld [vmem:[%s1398_s0 + $0x10] sm:$0xff]  ;;  %v31_v10 = vld [vmem:[%s1398_s0 + $0x18] sm:$0xff]  ;;  %v1122_v27 = vpack.i.bf16 %v14_v5, %v13_v2  ;;  %s1177_s0 = smov 96   ;;  %v1259_v57 = vld [vmem:[%s1397_s1 + $0x60] sm:$0xff] }
   0x4   :  { %1063 = vmatprep.subr.bf16.mxu1 %v1062_v4  ;;  %v193_v55 = vsub.s32 0, %v1253_v47  ;;  %vm1269_vm1 = vmpackc.low %vm32_vm0, %vm32_vm0  ;;  %v25_v40 = vld [vmem:[%s1397_s1 + $0x70] sm:$0xff] }
   0x5   :  { %1065 = vmatpush3.bf16.msra.mxu1 %v1062_v4 }
   0x6   :  { %1067 = vmatprep.subr.bf16.mxu1 %v1066_v7  ;;  %v194_v4 = vrot.slane %v1259_v57, %v193_v55 }
   0x9   :  { %1069 = vmatpush3.bf16.msra.mxu1 %v1066_v7  ;;  %v201_v7 = vsub.s32 1, %v1253_v47 }
   0xc   :  { %987 = vmatmul.mubr.msk.f32.vlgmr.msra.gmra.mrb[0].mxu1 %vm32_vm0, %v29_v8 }
   0xd   :  { %989 = vmatprep.mubr.msk.f32.mxu1 %vm32_vm0, %v30_v9 }
  0x10   :  { %990 = vmatmul.mubr.msk.f32.gmra.mrb[2].mxu1 %vm32_vm0, %v31_v10 }
  0xdf   :  { %v1223_v11 = vpop.f32.mrb[0].mxu1 }
  0xe0   :  { %v1225_v12 = vpop.f32.mrb[1].mxu1  ;;  %v133_v13 = vsel %vm32_vm0, %v1223_v11, 0.0  ;;  %v148_v14 = vmul.f32 %v1223_v11, %v1223_v11 }
  0xe1   :  { %134 = vadd.xlane.f32.xlu0 %v133_v13  ;;  %v147_v16 = vmul.f32 %v1225_v12, %v1225_v12  ;;  %v130_v18 = vsel %vm32_vm0, %v1225_v12, 0.0 }
  0xe2   :  { %v154_v15 = vsel %vm32_vm0, %v148_v14, 0.0 }
  0xe3   :  { %155 = vadd.xlane.f32.xlu1 %v154_v15  ;;  %v1234_v17 = vpop.f32.mrb[2].mxu1  ;;  %v151_v20 = vsel %vm32_vm0, %v147_v16, 0.0  ;;  %v202_v15 = vrot.slane %v1259_v57, %v201_v7 }
  0xe4   :  { %v1238_v19 = vpop.f32.mrb[3].mxu1  ;;  %v139_v23 = vsel %vm32_vm0, %v1234_v17, 0.0  ;;  %v150_v24 = vmul.f32 %v1234_v17, %v1234_v17 }
  0xe5   :  { %131 = vadd.xlane.f32.xlu0 %v130_v18  ;;  %v136_v21 = vsel %vm32_vm0, %v1238_v19, 0.0  ;;  %v149_v22 = vmul.f32 %v1238_v19, %v1238_v19 }
  0xe6   :  { %v160_v26 = vsel %vm32_vm0, %v150_v24, 0.0 }
  0xe7   :  { %152 = vadd.xlane.f32.xlu1 %v151_v20  ;;  %v157_v25 = vsel %vm32_vm0, %v149_v22, 0.0 }
  0xe9   :  { %137 = vadd.xlane.f32.xlu0 %v136_v21 }
  0xeb   :  { %140 = vadd.xlane.f32.xlu1 %v139_v23 }
  0xed   :  { %158 = vadd.xlane.f32.xlu0 %v157_v25 }
  0xef   :  { %161 = vadd.xlane.f32.xlu1 %v160_v26 }
 0x100   :  { %1123 = vrot.lane.b32.xlu1 %v1122_v27, %s1177_s0 }
 0x103   :  { %1118 = vrot.lane.b32.xlu0 %v1117_v3, %s1177_s0 }
 0x16e   :  { %v135_v28 = vpop.xlane.xlu0 %134 }
 0x16f   :  { %v144_v29 = vmul.f32 0.03125, %v135_v28 }
 0x170   :  { %v156_v30 = vpop.xlane.xlu1 %155 }
 0x171   :  { %v172_v31 = vmul.f32 %v144_v29, %v144_v29  ;;  %v164_v32 = vmul.f32 0.03125, %v156_v30  ;;  %v168_v62 = vsub.f32 %v1223_v11, %v144_v29 }
 0x172   :  { %v132_v33 = vpop.xlane.xlu0 %131 }
 0x173   :  { %v176_v34 = vsub.f32 %v164_v32, %v172_v31  ;;  %v143_v35 = vmul.f32 0.03125, %v132_v33 }
 0x174   :  { %v153_v36 = vpop.xlane.xlu1 %152 }
 0x175   :  { %v180_v37 = vadd.f32 1e-05, %v176_v34  ;;  %v171_v38 = vmul.f32 %v143_v35, %v143_v35  ;;  %v163_v39 = vmul.f32 0.03125, %v153_v36  ;;  %v167_v8 = vsub.f32 %v1225_v12, %v143_v35 }
 0x176   :  { %v138_v41 = vpop.xlane.xlu0 %137 }
 0x177   :  { %1137 = vrsqrt.f32 %v180_v37  ;;  %v175_v42 = vsub.f32 %v163_v39, %v171_v38  ;;  %v145_v43 = vmul.f32 0.03125, %v138_v41  ;;  %v24_v41 = vld [vmem:[%s1397_s1 + $0x68] sm:$0xff] }
 0x178   :  { %v141_v44 = vpop.xlane.xlu1 %140 }
 0x179   :  { %v179_v45 = vadd.f32 1e-05, %v175_v42  ;;  %v146_v46 = vmul.f32 0.03125, %v141_v44  ;;  %v173_v49 = vmul.f32 %v145_v43, %v145_v43  ;;  %v169_v18 = vsub.f32 %v1238_v19, %v145_v43 }
 0x17a   :  { %v159_v48 = vpop.xlane.xlu0 %158 }
 0x17b   :  { %1139 = vrsqrt.f32 %v179_v45  ;;  %v165_v50 = vmul.f32 0.03125, %v159_v48  ;;  %v174_v52 = vmul.f32 %v146_v46, %v146_v46  ;;  %v170_v24 = vsub.f32 %v1234_v17, %v146_v46 }
 0x17c   :  { %v162_v51 = vpop.xlane.xlu1 %161 }
 0x17d   :  { %v177_v53 = vsub.f32 %v165_v50, %v173_v49  ;;  %v166_v54 = vmul.f32 0.03125, %v162_v51  ;;  %v27_v49 = vld [vmem:[%s1397_s1 + $0x80] sm:$0xff]  ;;  %v26_v50 = vld [vmem:[%s1397_s1 + $0x78] sm:$0xff] }
 0x17e   :  { %v1119_v56 = vpop.permute.xlu0 %1118 }
 0x17f   :  { %v181_v58 = vadd.f32 1e-05, %v177_v53  ;;  %v178_v59 = vsub.f32 %v166_v54, %v174_v52  ;;  %v1121_v60 = vunpack.i.h.bf16 %v1119_v56  ;;  %v1120_v61 = vunpack.i.l.bf16 %v1119_v56 }
 0x180   :  { %v1124_v63 = vpop.permute.xlu1 %1123 }
 0x181   :  { %v1138_v0 = vpop.eup %1137  ;;  %1141 = vrsqrt.f32 %v181_v58  ;;  %v182_v1 = vadd.f32 1e-05, %v178_v59  ;;  %v1070_v2 = vpack.c.bf16 %v1121_v60, %v1120_v61  ;;  %v1126_v3 = vunpack.i.h.bf16 %v1124_v63 }
 0x182   :  { %v188_v5 = vmul.f32 %v1138_v0, %v168_v62  ;;  %v1125_v6 = vunpack.i.l.bf16 %v1124_v63 }
 0x183   :  { %1143 = vrsqrt.f32 %v182_v1  ;;  %1071 = vmatprep.subr.bf16.mxu1 %v1070_v2 }
 0x184   :  { %v1074_v9 = vpack.c.bf16 %v1126_v3, %v1125_v6  ;;  %1073 = vmatpush3.bf16.msra.mxu1 %v1070_v2  ;;  %v196_v13 = vmul.f32 %v194_v4, %v188_v5 }
 0x185   :  { %v1140_v10 = vpop.eup %1139 }
 0x186   :  { %1075 = vmatprep.subr.bf16.mxu1 %v1074_v9  ;;  %v187_v14 = vmul.f32 %v1140_v10, %v167_v8  ;;  %v204_v21 = vadd.f32 %v202_v15, %v196_v13 }
 0x188   :  { %1077 = vmatpush3.bf16.msra.mxu1 %v1074_v9  ;;  %v195_v16 = vmul.f32 %v194_v4, %v187_v14 }
 0x18a   :  { %v203_v20 = vadd.f32 %v202_v15, %v195_v16 }
 0x18b   :  { %v1142_v22 = vpop.eup %1141 }
 0x18c   :  { %1000 = vmatprep.mubr.msk.f32.mxu1 %vm32_vm0, %v203_v20  ;;  %v1078_v25 = vpack.c.bf16 %v204_v21, %v203_v20  ;;  %v189_v26 = vmul.f32 %v1142_v22, %v169_v18 }
 0x18d   :  { %v1144_v27 = vpop.eup %1143  ;;  %1001 = vmatmul.mubr.msk.f32.vlgmr.msra.gmra.mrb[4].mxu1 %vm32_vm0, %v204_v21 }
 0x18e   :  { %1080 = vmatprep.subr.msk.bf16.mxu0 %vm1269_vm1, %v1078_v25  ;;  %v197_v28 = vmul.f32 %v194_v4, %v189_v26  ;;  %v190_v29 = vmul.f32 %v1144_v27, %v170_v24 }
 0x18f   :  { %1083 = vmatpush3.bf16.xpose.msk.msra.mxu0 %vm1269_vm1, %v1078_v25 }
 0x190   :  { %v205_v30 = vadd.f32 %v202_v15, %v197_v28  ;;  %v198_v31 = vmul.f32 %v194_v4, %v190_v29 }
 0x192   :  { %1003 = vmatprep.mubr.msk.f32.mxu1 %vm32_vm0, %v205_v30  ;;  %v206_v32 = vadd.f32 %v202_v15, %v198_v31 }
 0x194   :  { %1004 = vmatmul.mubr.msk.f32.gmra.mrb[6].mxu1 %vm32_vm0, %v206_v32  ;;  %v1084_v33 = vpack.c.bf16 %v206_v32, %v205_v30 }
 0x196   :  { %1086 = vmatprep.subr.msk.bf16.mxu0 %vm1269_vm1, %v1084_v33 }
 0x197   :  { %1089 = vmatpush3.bf16.xpose.msk.msra.mxu0 %vm1269_vm1, %v1084_v33 }
 0x260   :  { %v1002_v34 = vpop.f32.mrb[4].mxu1 }
 0x261   :  { %v301_v35 = vpop.f32.mrb[5].mxu1 }
 0x262   :  { %v1127_v36 = vpack.i.bf16 %v1002_v34, %v301_v35  ;;  %1014 = vmatprep.mubr.msk.f32.mxu0 %vm32_vm0, %v301_v35 }
 0x263   :  { %1015 = vmatmul.mubr.msk.f32.vlgmr.msra.gmra.mrb[0].mxu0 %vm32_vm0, %v1002_v34 }
 0x267   :  { %v1005_v37 = vpop.f32.mrb[6].mxu1 }
 0x268   :  { %v311_v38 = vpop.f32.mrb[7].mxu1 }
 0x269   :  { %v1132_v39 = vpack.i.bf16 %v1005_v37, %v311_v38  ;;  %1017 = vmatprep.mubr.msk.f32.mxu0 %vm32_vm0, %v311_v38 }
 0x26a   :  { %1018 = vmatmul.mubr.msk.f32.gmra.mrb[2].mxu0 %vm32_vm0, %v1005_v37 }
 0x336   :  { %v1016_v42 = vpop.f32.mrb[0].mxu0 }
 0x337   :  { %v404_v43 = vadd.f32 %v1016_v42, %v25_v40  ;;  %v398_v44 = vpop.f32.mrb[1].mxu0 }
 0x338   :  { %v399_v45 = vadd.f32 %v398_v44, %v24_v41 }
 0x339   :  { %v420_v46 = vsel %vm32_vm0, %v404_v43, -inf }
 0x33a   :  { %421 = vmax.xlane.f32.xlu0 %v420_v46  ;;  %v417_v48 = vsel %vm32_vm0, %v399_v45, -inf }
 0x33b   :  { %418 = vmax.xlane.f32.xlu1 %v417_v48 }
 0x33d   :  { %v1019_v51 = vpop.f32.mrb[2].mxu0 }
 0x33e   :  { %v414_v52 = vadd.f32 %v1019_v51, %v27_v49  ;;  %v408_v53 = vpop.f32.mrb[3].mxu0 }
 0x33f   :  { %v409_v54 = vadd.f32 %v408_v53, %v26_v50 }
 0x340   :  { %v426_v55 = vsel %vm32_vm0, %v414_v52, -inf }
 0x341   :  { %427 = vmax.xlane.f32.xlu1 %v426_v55  ;;  %v423_v56 = vsel %vm32_vm0, %v409_v54, -inf  ;;  %v15_v55 = vld [vmem:[%s1397_s1 + $0x20] sm:$0xff] }
 0x342   :  { %424 = vmax.xlane.f32.xlu0 %v423_v56  ;;  %v16_v56 = vld [vmem:[%s1397_s1 + $0x28] sm:$0xff] }
 0x3c7   :  { %v422_v58 = vpop.xlane.xlu0 %421 }
 0x3c8   :  { %v430_v59 = vsub.f32 %v404_v43, %v422_v58  ;;  %v419_v60 = vpop.xlane.xlu1 %418  ;;  %v1098_v58 = vpack.c.bf16 %v16_v56, %v15_v55  ;;  %v19_v55 = vld [vmem:[%s1397_s1 + $0x40] sm:$0xff]  ;;  %v20_v56 = vld [vmem:[%s1397_s1 + $0x48] sm:$0xff] }
 0x3c9   :  { %v429_v61 = vsub.f32 %v399_v45, %v419_v60  ;;  %v18_v60 = vld [vmem:[%s1397_s1 + $0x38] sm:$0xff] }
 0x3ca   :  { %v435_v62 = vmul.f32 1.442695, %v430_v59  ;;  %v17_v59 = vld [vmem:[%s1397_s1 + $0x30] sm:$0xff] }
 0x3cb   :  { %v433_v63 = vmul.f32 1.442695, %v429_v61  ;;  %v1102_v61 = vpack.c.bf16 %v18_v60, %v17_v59  ;;  %v21_v59 = vld [vmem:[%s1397_s1 + $0x50] sm:$0xff]  ;;  %v22_v60 = vld [vmem:[%s1397_s1 + $0x58] sm:$0xff]  ;;  %s1178_s1 = smov 32  }
 0x3cc   :  { %1145 = vpow2.f32 %v435_v62 }
 0x3cd   :  { %1147 = vpow2.f32 %v433_v63 }
 0x3ce   :  { %v428_v0 = vpop.xlane.xlu1 %427 }
 0x3cf   :  { %v432_v1 = vsub.f32 %v414_v52, %v428_v0  ;;  %v425_v2 = vpop.xlane.xlu0 %424 }
 0x3d0   :  { %v431_v3 = vsub.f32 %v409_v54, %v425_v2 }
 0x3d1   :  { %v439_v4 = vmul.f32 1.442695, %v432_v1 }
 0x3d2   :  { %v437_v5 = vmul.f32 1.442695, %v431_v3 }
 0x3d3   :  { %1149 = vpow2.f32 %v439_v4 }
 0x3d4   :  { %1151 = vpow2.f32 %v437_v5 }
 0x3d6   :  { %v1146_v6 = vpop.eup %1145 }
 0x3d7   :  { %v1148_v7 = vpop.eup %1147  ;;  %v444_v8 = vsel %vm32_vm0, %v1146_v6, 0.0 }
 0x3d8   :  { %445 = vadd.xlane.f32.xlu1 %v444_v8  ;;  %v441_v9 = vsel %vm32_vm0, %v1148_v7, 0.0 }
 0x3d9   :  { %442 = vadd.xlane.f32.xlu0 %v441_v9 }
 0x3dd   :  { %v1150_v10 = vpop.eup %1149 }
 0x3de   :  { %v1152_v13 = vpop.eup %1151  ;;  %v450_v14 = vsel %vm32_vm0, %v1150_v10, 0.0 }
 0x3df   :  { %451 = vadd.xlane.f32.xlu1 %v450_v14  ;;  %v447_v15 = vsel %vm32_vm0, %v1152_v13, 0.0 }
 0x3e0   :  { %448 = vadd.xlane.f32.xlu0 %v447_v15 }
 0x3f0   :  { %1133 = vrot.lane.b32.xlu1 %v1132_v39, %s1177_s0 }
 0x3f6   :  { %1128 = vrot.lane.b32.xlu0 %v1127_v36, %s1177_s0 }
 0x465   :  { %v446_v18 = vpop.xlane.xlu1 %445 }
 0x466   :  { %v443_v16 = vpop.xlane.xlu0 %442 }
 0x467   :  { %1153 = vrcp.f32 %v443_v16 }
 0x468   :  { %1155 = vrcp.f32 %v446_v18 }
 0x46c   :  { %v452_v20 = vpop.xlane.xlu1 %451 }
 0x46d   :  { %v449_v21 = vpop.xlane.xlu0 %448 }
 0x46e   :  { %1157 = vrcp.f32 %v449_v21 }
 0x46f   :  { %1159 = vrcp.f32 %v452_v20 }
 0x470   :  { %v1134_v22 = vpop.permute.xlu1 %1133 }
 0x471   :  { %v1154_v23 = vpop.eup %1153  ;;  %v1136_v24 = vunpack.i.h.bf16 %v1134_v22  ;;  %v1129_v25 = vpop.permute.xlu0 %1128  ;;  %v1135_v26 = vunpack.i.l.bf16 %v1134_v22 }
 0x472   :  { %v1131_v27 = vunpack.i.h.bf16 %v1129_v25  ;;  %v1130_v28 = vunpack.i.l.bf16 %v1129_v25  ;;  %v457_v29 = vmul.f32 %v1154_v23, %v1148_v7  ;;  %v1156_v32 = vpop.eup %1155 }
 0x473   :  { %v1094_v31 = vpack.c.bf16 %v1136_v24, %v1135_v26  ;;  %v458_v34 = vmul.f32 %v1156_v32, %v1146_v6 }
 0x474   :  { %v1090_v30 = vpack.c.bf16 %v1131_v27, %v1130_v28  ;;  %1028 = vmatprep.mubr.msk.f32.mxu1 %vm32_vm0, %v457_v29  ;;  %v636_v27 = vsub.s32 2, %v1253_v47 }
 0x476   :  { %1091 = vmatprep.subr.bf16.mxu1 %v1090_v30 }
 0x477   :  { %1093 = vmatpush3.bf16.msra.mxu1 %v1090_v30 }
 0x478   :  { %1095 = vmatprep.subr.bf16.mxu1 %v1094_v31  ;;  %v1158_v33 = vpop.eup %1157 }
 0x479   :  { %v1160_v35 = vpop.eup %1159  ;;  %v459_v36 = vmul.f32 %v1158_v33, %v1152_v13  ;;  %v637_v33 = vrot.slane %v1259_v57, %v636_v27 }
 0x47a   :  { %v460_v37 = vmul.f32 %v1160_v35, %v1150_v10 }
 0x47b   :  { %1097 = vmatpush3.bf16.msra.mxu1 %v1094_v31  ;;  %v644_v31 = vsub.s32 3, %v1253_v47 }
 0x47c   :  { %1099 = vmatprep.subr.bf16.mxu1 %v1098_v58 }
 0x47e   :  { %1029 = vmatmul.mubr.msk.f32.vlgmr.msra.gmra.mrb[8].mxu1 %vm32_vm0, %v458_v34 }
 0x47f   :  { %1031 = vmatprep.mubr.msk.f32.mxu1 %vm32_vm0, %v459_v36  ;;  %1101 = vmatpush3.bf16.msra.mxu1 %v1098_v58  ;;  %v1106_v58 = vpack.c.bf16 %v20_v56, %v19_v55 }
 0x480   :  { %1103 = vmatprep.subr.bf16.mxu1 %v1102_v61 }
 0x481   :  { %1107 = vmatprep.subr.bf16.mxu0 %v1106_v58 }
 0x482   :  { %1032 = vmatmul.mubr.msk.f32.gmra.mrb[10].mxu1 %vm32_vm0, %v460_v37  ;;  %1109 = vmatpush3.bf16.xpose.msra.mxu0 %v1106_v58 }
 0x483   :  { %1105 = vmatpush3.bf16.msra.mxu1 %v1102_v61  ;;  %v1110_v61 = vpack.c.bf16 %v22_v60, %v21_v59 }
 0x485   :  { %1111 = vmatprep.subr.bf16.mxu0 %v1110_v61 }
 0x48a   :  { %1113 = vmatpush3.bf16.xpose.msra.mxu0 %v1110_v61 }
 0x551   :  { %v1030_v38 = vpop.f32.mrb[8].mxu1 }
 0x552   :  { %v1317_v39 = vadd.f32 %v1030_v38, %v1223_v11  ;;  %v551_v40 = vpop.f32.mrb[9].mxu1  ;;  %v645_v38 = vrot.slane %v1259_v57, %v644_v31 }
 0x553   :  { %v1320_v41 = vadd.f32 %v551_v40, %v1225_v12 }
 0x554   :  { %v577_v42 = vsel %vm32_vm0, %v1317_v39, 0.0  ;;  %v591_v46 = vmul.f32 %v1317_v39, %v1317_v39 }
 0x555   :  { %578 = vadd.xlane.f32.xlu0 %v577_v42  ;;  %v1033_v43 = vpop.f32.mrb[10].mxu1  ;;  %v574_v44 = vsel %vm32_vm0, %v1320_v41, 0.0  ;;  %v590_v45 = vmul.f32 %v1320_v41, %v1320_v41 }
 0x556   :  { %v1331_v11 = vadd.f32 %v1033_v43, %v1234_v17  ;;  %575 = vadd.xlane.f32.xlu1 %v574_v44  ;;  %v561_v12 = vpop.f32.mrb[11].mxu1  ;;  %v597_v50 = vsel %vm32_vm0, %v591_v46, 0.0 }
 0x557   :  { %v1334_v48 = vadd.f32 %v561_v12, %v1238_v19  ;;  %v594_v49 = vsel %vm32_vm0, %v590_v45, 0.0 }
 0x558   :  { %v583_v17 = vsel %vm32_vm0, %v1331_v11, 0.0  ;;  %v593_v19 = vmul.f32 %v1331_v11, %v1331_v11 }
 0x559   :  { %595 = vadd.xlane.f32.xlu0 %v594_v49  ;;  %v580_v51 = vsel %vm32_vm0, %v1334_v48, 0.0  ;;  %v592_v52 = vmul.f32 %v1334_v48, %v1334_v48 }
 0x55a   :  { %598 = vadd.xlane.f32.xlu1 %v597_v50  ;;  %v603_v54 = vsel %vm32_vm0, %v593_v19, 0.0 }
 0x55b   :  { %v600_v53 = vsel %vm32_vm0, %v592_v52, 0.0 }
 0x55d   :  { %581 = vadd.xlane.f32.xlu0 %v580_v51 }
 0x55e   :  { %584 = vadd.xlane.f32.xlu1 %v583_v17 }
 0x561   :  { %601 = vadd.xlane.f32.xlu0 %v600_v53 }
 0x562   :  { %604 = vadd.xlane.f32.xlu1 %v603_v54 }
 0x5e2   :  { %v579_v62 = vpop.xlane.xlu0 %578 }
 0x5e3   :  { %v576_v63 = vpop.xlane.xlu1 %575  ;;  %v587_v0 = vmul.f32 0.03125, %v579_v62  ;;  %v652_v62 = vsub.s32 4, %v1253_v47 }
 0x5e4   :  { %v586_v1 = vmul.f32 0.03125, %v576_v63 }
 0x5e5   :  { %v615_v6 = vmul.f32 %v587_v0, %v587_v0  ;;  %v611_v35 = vsub.f32 %v1317_v39, %v587_v0  ;;  %v653_v63 = vrot.slane %v1259_v57, %v652_v62 }
 0x5e6   :  { %v614_v2 = vmul.f32 %v586_v1, %v586_v1  ;;  %v596_v3 = vpop.xlane.xlu0 %595  ;;  %v610_v32 = vsub.f32 %v1320_v41, %v586_v1 }
 0x5e7   :  { %v606_v4 = vmul.f32 0.03125, %v596_v3  ;;  %v599_v5 = vpop.xlane.xlu1 %598 }
 0x5e8   :  { %v607_v7 = vmul.f32 0.03125, %v599_v5 }
 0x5e9   :  { %v618_v8 = vsub.f32 %v606_v4, %v614_v2 }
 0x5ea   :  { %v619_v9 = vsub.f32 %v607_v7, %v615_v6  ;;  %v582_v10 = vpop.xlane.xlu0 %581 }
 0x5eb   :  { %v622_v13 = vadd.f32 1e-05, %v618_v8  ;;  %v588_v14 = vmul.f32 0.03125, %v582_v10  ;;  %v585_v15 = vpop.xlane.xlu1 %584 }
 0x5ec   :  { %v623_v16 = vadd.f32 1e-05, %v619_v9  ;;  %v589_v18 = vmul.f32 0.03125, %v585_v15 }
 0x5ed   :  { %1161 = vrsqrt.f32 %v622_v13  ;;  %v616_v21 = vmul.f32 %v588_v14, %v588_v14  ;;  %v612_v46 = vsub.f32 %v1334_v48, %v588_v14 }
 0x5ee   :  { %1163 = vrsqrt.f32 %v623_v16  ;;  %v602_v20 = vpop.xlane.xlu0 %601  ;;  %v617_v24 = vmul.f32 %v589_v18, %v589_v18  ;;  %v613_v49 = vsub.f32 %v1331_v11, %v589_v18 }
 0x5ef   :  { %v608_v22 = vmul.f32 0.03125, %v602_v20  ;;  %v605_v23 = vpop.xlane.xlu1 %604 }
 0x5f0   :  { %v609_v25 = vmul.f32 0.03125, %v605_v23 }
 0x5f1   :  { %v620_v26 = vsub.f32 %v608_v22, %v616_v21 }
 0x5f2   :  { %v621_v28 = vsub.f32 %v609_v25, %v617_v24 }
 0x5f3   :  { %v624_v29 = vadd.f32 1e-05, %v620_v26 }
 0x5f4   :  { %v625_v30 = vadd.f32 1e-05, %v621_v28 }
 0x5f5   :  { %1165 = vrsqrt.f32 %v624_v29 }
 0x5f6   :  { %1167 = vrsqrt.f32 %v625_v30 }
 0x5f7   :  { %v1162_v34 = vpop.eup %1161 }
 0x5f8   :  { %v1164_v36 = vpop.eup %1163  ;;  %v630_v37 = vmul.f32 %v1162_v34, %v610_v32 }
 0x5f9   :  { %v631_v40 = vmul.f32 %v1164_v36, %v611_v35 }
 0x5fa   :  { %v638_v42 = vmul.f32 %v637_v33, %v630_v37 }
 0x5fb   :  { %v639_v43 = vmul.f32 %v637_v33, %v631_v40 }
 0x5fc   :  { %v646_v44 = vadd.f32 %v645_v38, %v638_v42 }
 0x5fd   :  { %v647_v45 = vadd.f32 %v645_v38, %v639_v43 }
 0x5fe   :  { %1042 = vmatprep.mubr.msk.f32.mxu1 %vm32_vm0, %v646_v44 }
 0x5ff   :  { %v1166_v12 = vpop.eup %1165  ;;  %1043 = vmatmul.mubr.msk.f32.vlgmr.msra.gmra.mrb[12].mxu1 %vm32_vm0, %v647_v45 }
 0x600   :  { %v1168_v50 = vpop.eup %1167  ;;  %v632_v51 = vmul.f32 %v1166_v12, %v612_v46 }
 0x601   :  { %v633_v52 = vmul.f32 %v1168_v50, %v613_v49 }
 0x602   :  { %v640_v17 = vmul.f32 %v637_v33, %v632_v51  ;;  %v878_v51 = vsub.s32 5, %v1253_v47 }
 0x603   :  { %v641_v19 = vmul.f32 %v637_v33, %v633_v52 }
 0x604   :  { %v648_v53 = vadd.f32 %v645_v38, %v640_v17  ;;  %v879_v52 = vrot.slane %v1259_v57, %v878_v51 }
 0x605   :  { %v649_v54 = vadd.f32 %v645_v38, %v641_v19 }
 0x606   :  { %1045 = vmatprep.mubr.msk.f32.mxu1 %vm32_vm0, %v648_v53 }
 0x607   :  { %1046 = vmatmul.mubr.msk.f32.gmra.mrb[14].mxu1 %vm32_vm0, %v649_v54 }
 0x6d2   :  { %v1044_v0 = vpop.f32.mrb[12].mxu1 }
 0x6d3   :  { %v738_v1 = vadd.f32 %v1044_v0, %v653_v63  ;;  %v732_v2 = vpop.f32.mrb[13].mxu1 }
 0x6d4   :  { %v733_v3 = vadd.f32 %v732_v2, %v653_v63 }
 0x6d5   :  { %v752_v4 = vmul.f32 %v738_v1, %v738_v1 }
 0x6d6   :  { %v751_v5 = vmul.f32 %v733_v3, %v733_v3 }
 0x6d7   :  { %v756_v6 = vmul.f32 %v752_v4, %v738_v1 }
 0x6d8   :  { %v755_v7 = vmul.f32 %v751_v5, %v733_v3 }
 0x6d9   :  { %v760_v8 = vmul.f32 0.044715, %v756_v6 }
 0x6da   :  { %v759_v9 = vmul.f32 0.044715, %v755_v7  ;;  %v1047_v10 = vpop.f32.mrb[14].mxu1 }
 0x6db   :  { %v764_v13 = vadd.f32 %v760_v8, %v738_v1  ;;  %v748_v14 = vadd.f32 %v1047_v10, %v653_v63  ;;  %v742_v15 = vpop.f32.mrb[15].mxu1 }
 0x6dc   :  { %v763_v16 = vadd.f32 %v759_v9, %v733_v3  ;;  %v743_v18 = vadd.f32 %v742_v15, %v653_v63 }
 0x6dd   :  { %v768_v20 = vmul.f32 0.7978846, %v764_v13  ;;  %v754_v21 = vmul.f32 %v748_v14, %v748_v14 }
 0x6de   :  { %v767_v22 = vmul.f32 0.7978846, %v763_v16  ;;  %v753_v23 = vmul.f32 %v743_v18, %v743_v18 }
 0x6df   :  { %1169 = vtanh.f32 %v768_v20  ;;  %v758_v24 = vmul.f32 %v754_v21, %v748_v14 }
 0x6e0   :  { %v757_v25 = vmul.f32 %v753_v23, %v743_v18  ;;  %1171 = vtanh.f32 %v767_v22 }
 0x6e1   :  { %v762_v26 = vmul.f32 0.044715, %v758_v24 }
 0x6e2   :  { %v761_v27 = vmul.f32 0.044715, %v757_v25 }
 0x6e3   :  { %v766_v28 = vadd.f32 %v762_v26, %v748_v14 }
 0x6e4   :  { %v765_v29 = vadd.f32 %v761_v27, %v743_v18 }
 0x6e5   :  { %v770_v30 = vmul.f32 0.7978846, %v766_v28 }
 0x6e6   :  { %v769_v31 = vmul.f32 0.7978846, %v765_v29 }
 0x6e7   :  { %1173 = vtanh.f32 %v770_v30 }
 0x6e8   :  { %1175 = vtanh.f32 %v769_v31 }
 0x6e9   :  { %v1170_v32 = vpop.eup %1169 }
 0x6ea   :  { %v1172_v33 = vpop.eup %1171  ;;  %v776_v34 = vadd.f32 1.0, %v1170_v32 }
 0x6eb   :  { %v775_v35 = vadd.f32 1.0, %v1172_v33 }
 0x6ec   :  { %v780_v36 = vmul.f32 0.5, %v776_v34 }
 0x6ed   :  { %v779_v37 = vmul.f32 0.5, %v775_v35 }
 0x6ee   :  { %v784_v40 = vmul.f32 %v780_v36, %v738_v1 }
 0x6ef   :  { %v783_v38 = vmul.f32 %v779_v37, %v733_v3 }
 0x6f1   :  { %v1174_v42 = vpop.eup %1173  ;;  %1056 = vmatprep.mubr.f32.mxu0 %v783_v38 }
 0x6f2   :  { %v1176_v43 = vpop.eup %1175  ;;  %1057 = vmatmul.mubr.f32.vlgmr.msra.gmra.mrb[4].mxu0 %v784_v40  ;;  %v778_v44 = vadd.f32 1.0, %v1174_v42 }
 0x6f3   :  { %v777_v45 = vadd.f32 1.0, %v1176_v43 }
 0x6f4   :  { %v782_v46 = vmul.f32 0.5, %v778_v44 }
 0x6f5   :  { %v781_v12 = vmul.f32 0.5, %v777_v45 }
 0x6f6   :  { %v786_v50 = vmul.f32 %v782_v46, %v748_v14 }
 0x6f7   :  { %v785_v49 = vmul.f32 %v781_v12, %v743_v18 }
 0x6f9   :  { %1059 = vmatprep.mubr.f32.mxu0 %v785_v49 }
 0x6fa   :  { %1060 = vmatmul.mubr.f32.gmra.mrb[6].mxu0 %v786_v50 }
 0x7c5   :  { %v1058_v17 = vpop.f32.mrb[4].mxu0 }
 0x7c6   :  { %v873_v19 = vadd.f32 %v1058_v17, %v1317_v39  ;;  %v853_v53 = vpop.f32.mrb[5].mxu0 }
 0x7c7   :  { %v872_v54 = vadd.f32 %v853_v53, %v1320_v41 }
 0x7c8   :  { %v881_v55 = vadd.f32 %v879_v52, %v873_v19 }
 0x7c9   :  { %v880_v56 = vadd.f32 %v879_v52, %v872_v54 }
 0x7ca   :  { %885 = vrot.lane.b32.xlu0 %v881_v55, %s1178_s1 }
 0x7cd   :  { %v1061_v58 = vpop.f32.mrb[6].mxu0 }
 0x7ce   :  { %v863_v59 = vpop.f32.mrb[7].mxu0  ;;  %v875_v61 = vadd.f32 %v1061_v58, %v1331_v11 }
 0x7cf   :  { %v874_v60 = vadd.f32 %v863_v59, %v1334_v48 }
 0x7d0   :  { %v883_v47 = vadd.f32 %v879_v52, %v875_v61 }
 0x7d1   :  { %v882_v62 = vadd.f32 %v879_v52, %v874_v60 }
 0x7d3   :  { %889 = vrot.lane.b32.xlu1 %v882_v62, %s1179_s23 }
 0x7d7   :  { %893 = vrot.lane.b32.xlu1 %v883_v47, %s1177_s0 }
 0x83c   :  { %v886_v57 = vpop.permute.xlu0 %885 }
 0x83d   :  { %v896_v41 = vsel %vm32_vm0, %v880_v56, %v886_v57 }
 0x845   :  { %v890_v39 = vpop.permute.xlu1 %889 }
 0x846   :  { %v898_v63 = vsel %vm897_vm2, %v896_v41, %v890_v39 }
 0x849   :  { %v894_v0 = vpop.permute.xlu1 %893 }
 0x84a   :  { %v900_v1 = vsel %vm899_vm3, %v898_v63, %v894_v0 }
 0x84b   :  { %901 = vst [vmem:[%s1399_s2] sm:$0xff] %v900_v1 }

</bundles_post_ra>
